<compile_context>
chip_gen: v7x
topology: tpu7x:2x2x1
jax: 0.10.0
libtpu: 0.0.40
codegen_flags: <defaults>
</compile_context>

<pallas_src>
import functools
import math

import jax
import jax.numpy as jnp
from jax import lax
from jax.experimental import pallas as pl
from jax.experimental.pallas import tpu as pltpu

BERT_HIDDEN = 768  # hard-coded in BertClassificationHead (bert_output_dim)
VMEM_LIMIT = 64 * 1024 * 1024  # explicit scoped-VMEM limit (fits v7x physical)


# ----------------------------------------------------------------------------
# helpers
# ----------------------------------------------------------------------------
def _pick_tile(dim, target, align, min_steps=1):
    """Largest multiple of `align` that divides `dim`, is <= target, and
    (when possible) yields at least `min_steps` grid steps."""
    cap = min(target, max(align, dim // max(min_steps, 1)))
    cap = max(align, (cap // align) * align)
    t = cap
    while t >= align:
        if dim % t == 0:
            return t
        t -= align
    return dim


def _layernorm_f32(y, gamma_row, beta_row, out_dtype):
    mu = jnp.mean(y, axis=-1, keepdims=True)
    yc = y - mu
    var = jnp.mean(yc * yc, axis=-1, keepdims=True)
    inv = lax.rsqrt(var + 1e-12)  # BERT LayerNorm eps
    return (yc * inv * gamma_row + beta_row).astype(out_dtype)


# ----------------------------------------------------------------------------
# Pallas kernels
# ----------------------------------------------------------------------------
def _layernorm_kernel(x_ref, g_ref, b_ref, o_ref):
    """Row-tiled LayerNorm over the last dim (eps = 1e-12)."""
    x = x_ref[...].astype(jnp.float32)
    o_ref[...] = _layernorm_f32(x, g_ref[...], b_ref[...], o_ref.dtype)


def layer_norm(x, gamma, beta, out_dtype=jnp.bfloat16, tm_target=512):
    M, H = x.shape
    tm = _pick_tile(M, tm_target, 8, min_steps=2)
    return pl.pallas_call(
        _layernorm_kernel,
        out_shape=jax.ShapeDtypeStruct((M, H), out_dtype),
        grid_spec=pltpu.PrefetchScalarGridSpec(
            num_scalar_prefetch=0,
            grid=(M // tm,),
            in_specs=[
                pl.BlockSpec((tm, H), lambda i: (i, 0)),
                pl.BlockSpec((1, H), lambda i: (0, 0)),
                pl.BlockSpec((1, H), lambda i: (0, 0)),
            ],
            out_specs=pl.BlockSpec((tm, H), lambda i: (i, 0)),
        ),
        compiler_params=pltpu.CompilerParams(
            dimension_semantics=("parallel",),
            vmem_limit_bytes=VMEM_LIMIT),
    )(x, gamma.reshape(1, H), beta.reshape(1, H))


def _attn_block_kernel(x_ref, wqkv_ref, bqkv_ref, wo_ref, bo_ref, g_ref, bt_ref,
                       m_ref, o_ref, qkv_sc, ctx_sc, *,
                       num_heads, head_dim, scale, hidden):
    """Fused attention sublayer for ONE batch element:
       LayerNorm( wo( attention( x @ w_qkv + b_qkv ) ) + bo + x ).

    The QKV slab and the per-head contexts stay in VMEM scratch; heads are
    processed in lane-aligned pairs (2*64 = 128 lanes) with contexts written
    straight into the (S, H) ctx scratch column slab.
    """
    H = hidden
    x = x_ref[...]                                          # (S, H) bf16

    # QKV projection (one MXU op), bias added in f32, stored bf16 in scratch.
    qkv = jnp.dot(x, wqkv_ref[...], preferred_element_type=jnp.float32)
    qkv_sc[...] = (qkv + bqkv_ref[...]).astype(jnp.bfloat16)

    mask = m_ref[0]                                         # (1, S) additive

    group = 2 if (num_heads % 2 == 0 and 2 * head_dim == 128) else 1
    gw = group * head_dim
    for gidx in range(num_heads // group):
        c0 = gidx * gw
        qg = qkv_sc[:, c0:c0 + gw]                          # (S, gw) bf16
        kg = qkv_sc[:, H + c0:H + c0 + gw]
        vg = qkv_sc[:, 2 * H + c0:2 * H + c0 + gw]
        ctxs = []
        for hh in range(group):
            lo, hi = hh * head_dim, (hh + 1) * head_dim
            q, k, v = qg[:, lo:hi], kg[:, lo:hi], vg[:, lo:hi]
            # q @ k^T without an explicit transpose.
            s = lax.dot_general(q, k, (((1,), (1,)), ((), ())),
                                preferred_element_type=jnp.float32) * scale
            s = s + mask                                    # broadcast rows
            s = s - jnp.max(s, axis=-1, keepdims=True)
            p = jnp.exp(s)
            p = p * pl.reciprocal(jnp.sum(p, axis=-1, keepdims=True),
                                  approx=True)
            ctxs.append(jnp.dot(p.astype(v.dtype), v,
                                preferred_element_type=jnp.float32))
        ctx_g = ctxs[0] if group == 1 else jnp.concatenate(ctxs, axis=-1)
        ctx_sc[:, c0:c0 + gw] = ctx_g.astype(jnp.bfloat16)

    # Output projection + residual + LayerNorm (fused epilogue).
    y = jnp.dot(ctx_sc[...], wo_ref[...], preferred_element_type=jnp.float32)
    y = y + bo_ref[...] + x.astype(jnp.float32)
    o_ref[...] = _layernorm_f32(y, g_ref[...], bt_ref[...], o_ref.dtype)


def attention_block(x, layer, mask_add, num_heads, seq_len):
    M, H = x.shape
    B = M // seq_len
    dh = H // num_heads
    scale = 1.0 / math.sqrt(dh)
    kernel = functools.partial(_attn_block_kernel, num_heads=num_heads,
                               head_dim=dh, scale=scale, hidden=H)
    return pl.pallas_call(
        kernel,
        out_shape=jax.ShapeDtypeStruct((M, H), jnp.bfloat16),
        grid_spec=pltpu.PrefetchScalarGridSpec(
            num_scalar_prefetch=0,
            grid=(B,),
            in_specs=[
                pl.BlockSpec((seq_len, H), lambda b: (b, 0)),        # x / res
                pl.BlockSpec((H, 3 * H), lambda b: (0, 0)),          # w_qkv
                pl.BlockSpec((1, 3 * H), lambda b: (0, 0)),          # b_qkv
                pl.BlockSpec((H, H), lambda b: (0, 0)),              # wo
                pl.BlockSpec((1, H), lambda b: (0, 0)),              # bo
                pl.BlockSpec((1, H), lambda b: (0, 0)),              # ln1_g
                pl.BlockSpec((1, H), lambda b: (0, 0)),              # ln1_b
                pl.BlockSpec((1, 1, seq_len), lambda b: (b, 0, 0)),  # mask
            ],
            out_specs=pl.BlockSpec((seq_len, H), lambda b: (b, 0)),
            scratch_shapes=[
                pltpu.VMEM((seq_len, 3 * H), jnp.bfloat16),   # QKV slab
                pltpu.VMEM((seq_len, H), jnp.bfloat16),       # context slab
            ],
        ),
        compiler_params=pltpu.CompilerParams(
            dimension_semantics=("parallel",),
            vmem_limit_bytes=VMEM_LIMIT),
    )(x, layer["w_qkv"], layer["b_qkv"].reshape(1, 3 * H),
      layer["wo"], layer["bo"].reshape(1, H),
      layer["ln1_g"].reshape(1, H), layer["ln1_b"].reshape(1, H),
      mask_add)


def _ffn_block_kernel(x_ref, wi_ref, bi_ref, wf_ref, bf_ref, g_ref, bt_ref,
                      o_ref):
    """Fused FFN sublayer: LayerNorm( wf(GELU(wi(x) + bi)) + bf + x )."""
    x = x_ref[...]                                           # (tm, H) bf16
    h = jnp.dot(x, wi_ref[...], preferred_element_type=jnp.float32)
    h = h + bi_ref[...]
    # tanh-approx GELU, computed in f32.
    # TODO(synk): HF BERT uses erf-GELU.
    h = 0.5 * h * (1.0 + jnp.tanh(
        0.7978845608028654 * (h + 0.044715 * h * h * h)))
    y = jnp.dot(h.astype(jnp.bfloat16), wf_ref[...],
                preferred_element_type=jnp.float32)
    y = y + bf_ref[...] + x.astype(jnp.float32)
    o_ref[...] = _layernorm_f32(y, g_ref[...], bt_ref[...], o_ref.dtype)


def ffn_block(x, layer, tm_target=256):
    M, H = x.shape
    I = layer["wi"].shape[1]
    tm = _pick_tile(M, tm_target, 8, min_steps=2)   # tm <= 256 (v7x VMEM)
    return pl.pallas_call(
        _ffn_block_kernel,
        out_shape=jax.ShapeDtypeStruct((M, H), jnp.bfloat16),
        grid_spec=pltpu.PrefetchScalarGridSpec(
            num_scalar_prefetch=0,
            grid=(M // tm,),
            in_specs=[
                pl.BlockSpec((tm, H), lambda i: (i, 0)),     # x / residual
                pl.BlockSpec((H, I), lambda i: (0, 0)),      # wi (resident)
                pl.BlockSpec((1, I), lambda i: (0, 0)),      # bi
                pl.BlockSpec((I, H), lambda i: (0, 0)),      # wf (resident)
                pl.BlockSpec((1, H), lambda i: (0, 0)),      # bf
                pl.BlockSpec((1, H), lambda i: (0, 0)),      # ln2_g
                pl.BlockSpec((1, H), lambda i: (0, 0)),      # ln2_b
            ],
            out_specs=pl.BlockSpec((tm, H), lambda i: (i, 0)),
        ),
        compiler_params=pltpu.CompilerParams(
            dimension_semantics=("parallel",),
            vmem_limit_bytes=VMEM_LIMIT),
    )(x, layer["wi"], layer["bi"].reshape(1, I),
      layer["wf"], layer["bf"].reshape(1, H),
      layer["ln2_g"].reshape(1, H), layer["ln2_b"].reshape(1, H))


def _head_kernel(x_ref, w1_ref, b1_ref, w2_ref, b2_ref, o_ref):
    """Fused BertClassificationHead: l2(relu(l1(cls))), lane-padded to 128."""
    h = jnp.dot(x_ref[...], w1_ref[...], preferred_element_type=jnp.float32)
    h = jnp.maximum(h + b1_ref[...], 0.0)
    # dropout: identity (eval mode)
    logits = jnp.dot(h.astype(w2_ref.dtype), w2_ref[...],
                     preferred_element_type=jnp.float32)
    o_ref[...] = (logits + b2_ref[...]).astype(o_ref.dtype)


def classification_head(cls_state, w1, b1, w2, b2):
    B = cls_state.shape[0]
    Hh = w1.shape[1]
    O = w2.shape[1]
    # Lane-dense padding (multiples of 128) so stores are unmasked.
    Hp = max(128, pl.cdiv(Hh, 128) * 128)
    Op = max(128, pl.cdiv(O, 128) * 128)
    w1p = jnp.zeros((w1.shape[0], Hp), w1.dtype).at[:, :Hh].set(w1)
    b1p = jnp.zeros((1, Hp), jnp.float32).at[:, :Hh].set(b1)
    w2p = jnp.zeros((Hp, Op), w2.dtype).at[:Hh, :O].set(w2)
    b2p = jnp.zeros((1, Op), jnp.float32).at[:, :O].set(b2)
    logits_p = pl.pallas_call(
        _head_kernel,
        out_shape=jax.ShapeDtypeStruct((B, Op), jnp.float32),
        compiler_params=pltpu.CompilerParams(vmem_limit_bytes=VMEM_LIMIT),
    )(cls_state.astype(jnp.bfloat16), w1p, b1p, w2p, b2p)
    return logits_p[:, :O]


# ----------------------------------------------------------------------------
# Deterministic synthetic parameters (weights bf16, norms/biases f32)
# ----------------------------------------------------------------------------
def _dense_params(key, din, dout):
    w = (jax.random.normal(key, (din, dout), jnp.float32) * 0.02
         ).astype(jnp.bfloat16)
    return w, jnp.zeros((dout,), jnp.float32)


def init_params(key, *, vocab_size, max_pos, num_layers, num_heads,
                intermediate, head_hidden_dim, output_dim):
    H = BERT_HIDDEN
    keys = iter(jax.random.split(key, 16 + 8 * num_layers))
    params = {
        "num_heads": num_heads,
        "word_emb": jax.random.normal(next(keys), (vocab_size, H)) * 0.02,
        "pos_emb": jax.random.normal(next(keys), (max_pos, H)) * 0.02,
        "type_emb": jax.random.normal(next(keys), (2, H)) * 0.02,
        "emb_ln_g": jnp.ones((H,), jnp.float32),
        "emb_ln_b": jnp.zeros((H,), jnp.float32),
        "layers": [],
    }
    for _ in range(num_layers):
        layer = {}
        wq = jax.random.normal(next(keys), (H, H)) * 0.02
        wk = jax.random.normal(next(keys), (H, H)) * 0.02
        wv = jax.random.normal(next(keys), (H, H)) * 0.02
        layer["w_qkv"] = jnp.concatenate([wq, wk, wv], axis=1).astype(jnp.bfloat16)
        layer["b_qkv"] = jnp.zeros((3 * H,), jnp.float32)
        layer["wo"], layer["bo"] = _dense_params(next(keys), H, H)
        layer["ln1_g"] = jnp.ones((H,), jnp.float32)
        layer["ln1_b"] = jnp.zeros((H,), jnp.float32)
        layer["wi"], layer["bi"] = _dense_params(next(keys), H, intermediate)
        layer["wf"], layer["bf"] = _dense_params(next(keys), intermediate, H)
        layer["ln2_g"] = jnp.ones((H,), jnp.float32)
        layer["ln2_b"] = jnp.zeros((H,), jnp.float32)
        params["layers"].append(layer)
    head = {}
    head["w1"], head["b1"] = _dense_params(next(keys), H, head_hidden_dim)
    head["w2"], head["b2"] = _dense_params(next(keys), head_hidden_dim, output_dim)
    params["head"] = head
    return params


# ----------------------------------------------------------------------------
# Forward pass (embedding gather in JAX glue; everything else in Pallas)
# ----------------------------------------------------------------------------
def conv_abuse_bert_forward(params, input_ids, attention_mask):
    B, S = input_ids.shape
    H = BERT_HIDDEN
    nH = params["num_heads"]
    M = B * S

    # --- embeddings (gather is glue; LayerNorm in Pallas, bf16 input) ---
    emb = (jnp.take(params["word_emb"], input_ids, axis=0)
           + params["pos_emb"][None, :S, :]
           + params["type_emb"][0][None, None, :])          # token_type_ids = 0
    x = layer_norm(emb.reshape(M, H).astype(jnp.bfloat16),
                   params["emb_ln_g"], params["emb_ln_b"])   # (M, H) bf16
    # embedding dropout: identity (eval mode)

    # --- additive attention mask: [B, 1, S] ---
    mask_add = ((1.0 - attention_mask.astype(jnp.float32)) * -10000.0
                ).reshape(B, 1, S)

    # --- encoder: one fused pallas_call per sublayer ---
    for layer in params["layers"]:
        x = attention_block(x, layer, mask_add, nH, S)       # (M, H) bf16
        x = ffn_block(x, layer)                              # (M, H) bf16

    last_hidden_state = x.reshape(B, S, H)

    # --- BertClassificationHead (single fused, lane-dense Pallas call) ---
    cls_token_state = last_hidden_state[:, 0, :]             # [B, 768]
    logits = classification_head(cls_token_state,
                                 params["head"]["w1"], params["head"]["b1"],
                                 params["head"]["w2"], params["head"]["b2"])
    return logits


# ----------------------------------------------------------------------------
if __name__ == "__main__":
    B, S = 2, 8
    VOCAB, MAX_POS = 100, 64
    NUM_LAYERS, NUM_HEADS, INTERMEDIATE = 2, 12, 1536
    HEAD_HIDDEN, OUTPUT_DIM = 32, 2

    root = jax.random.PRNGKey(0)
    k_params, k_ids = jax.random.split(root)
    params = init_params(
        k_params, vocab_size=VOCAB, max_pos=MAX_POS, num_layers=NUM_LAYERS,
        num_heads=NUM_HEADS, intermediate=INTERMEDIATE,
        head_hidden_dim=HEAD_HIDDEN, output_dim=OUTPUT_DIM)

    input_ids = jax.random.randint(k_ids, (B, S), 0, VOCAB, dtype=jnp.int32)
    attention_mask = jnp.array(
        [[1, 1, 1, 1, 1, 1, 1, 1],
         [1, 1, 1, 1, 1, 1, 0, 0]], dtype=jnp.int32)

    logits = conv_abuse_bert_forward(params, input_ids, attention_mask)
    jax.block_until_ready(logits)
    assert logits.shape == (B, OUTPUT_DIM)
    print("KERNEL_OK")
</pallas_src>

<mosaic_0001>
module attributes {stable_mosaic.version = 11 : i64} {
  func.func @_layernorm_kernel(%arg0: i32, %arg1: memref<8x768xbf16, #tpu.memory_space<vmem>>, %arg2: memref<1x768xf32, #tpu.memory_space<vmem>>, %arg3: memref<1x768xf32, #tpu.memory_space<vmem>>, %arg4: memref<8x768xbf16, #tpu.memory_space<vmem>>) attributes {dimension_semantics = [#tpu.dimension_semantics<parallel>], iteration_bounds = array<i64: 2>, scalar_prefetch = 0 : i64, scratch_operands = 0 : i64, tpu.core_type = #tpu.core_type<tc>, window_params = [{transform_indices = @transform_0, window_bounds = array<i64: 8, 768>}, {pipeline_mode = #tpu.pipeline_mode<synchronous>, transform_indices = @transform_1, window_bounds = array<i64: 1, 768>}, {pipeline_mode = #tpu.pipeline_mode<synchronous>, transform_indices = @transform_2, window_bounds = array<i64: 1, 768>}, {transform_indices = @transform_3, window_bounds = array<i64: 8, 768>}]} {
    %c0 = arith.constant 0 : index
    %c0_0 = arith.constant 0 : index
    %0 = vector.load %arg1[%c0, %c0_0] : memref<8x768xbf16, #tpu.memory_space<vmem>>, vector<8x768xbf16>
    %1 = arith.extf %0 : vector<8x768xbf16> to vector<8x768xf32>
    %c0_1 = arith.constant 0 : index
    %c0_2 = arith.constant 0 : index
    %2 = vector.load %arg2[%c0_1, %c0_2] : memref<1x768xf32, #tpu.memory_space<vmem>>, vector<1x768xf32>
    %c0_3 = arith.constant 0 : index
    %c0_4 = arith.constant 0 : index
    %3 = vector.load %arg3[%c0_3, %c0_4] : memref<1x768xf32, #tpu.memory_space<vmem>>, vector<1x768xf32>
    %cst = arith.constant dense<0.000000e+00> : vector<8xf32>
    %4 = vector.multi_reduction <add>, %1, %cst [1] : vector<8x768xf32> to vector<8xf32>
    %5 = vector.shape_cast %4 : vector<8xf32> to vector<8x1xf32>
    %cst_5 = arith.constant 7.680000e+02 : f32
    %6 = vector.broadcast %cst_5 : f32 to vector<8x1xf32>
    %7 = arith.divf %5, %6 : vector<8x1xf32>
    %8 = vector.broadcast %7 : vector<8x1xf32> to vector<8x768xf32>
    %9 = arith.subf %1, %8 : vector<8x768xf32>
    %10 = arith.mulf %9, %9 : vector<8x768xf32>
    %cst_6 = arith.constant dense<0.000000e+00> : vector<8xf32>
    %11 = vector.multi_reduction <add>, %10, %cst_6 [1] : vector<8x768xf32> to vector<8xf32>
    %12 = vector.shape_cast %11 : vector<8xf32> to vector<8x1xf32>
    %cst_7 = arith.constant 7.680000e+02 : f32
    %13 = vector.broadcast %cst_7 : f32 to vector<8x1xf32>
    %14 = arith.divf %12, %13 : vector<8x1xf32>
    %cst_8 = arith.constant 9.99999996E-13 : f32
    %15 = vector.broadcast %cst_8 : f32 to vector<8x1xf32>
    %16 = arith.addf %14, %15 : vector<8x1xf32>
    %17 = math.rsqrt %16 : vector<8x1xf32>
    %18 = vector.broadcast %17 : vector<8x1xf32> to vector<8x768xf32>
    %19 = arith.mulf %9, %18 : vector<8x768xf32>
    %20 = vector.broadcast %2 : vector<1x768xf32> to vector<8x768xf32>
    %21 = arith.mulf %19, %20 : vector<8x768xf32>
    %22 = vector.broadcast %3 : vector<1x768xf32> to vector<8x768xf32>
    %23 = arith.addf %21, %22 : vector<8x768xf32>
    %24 = arith.truncf %23 : vector<8x768xf32> to vector<8x768xbf16>
    %c0_9 = arith.constant 0 : index
    %c0_10 = arith.constant 0 : index
    %25 = vector.load %arg4[%c0_9, %c0_10] : memref<8x768xbf16, #tpu.memory_space<vmem>>, vector<8x768xbf16>
    tpu.vector_store %arg4[%c0_9, %c0_10], %24 {strides = array<i32>} : memref<8x768xbf16, #tpu.memory_space<vmem>>, vector<8x768xbf16>,
    return
  }
  func.func @transform_0(%arg0: i32) -> (i32, i32) {
    %c0_i32 = arith.constant 0 : i32
    %c0_i32_0 = arith.constant 0 : i32
    return %arg0, %c0_i32 : i32, i32
  }
  func.func @transform_1(%arg0: i32) -> (i32, i32) {
    %c0_i32 = arith.constant 0 : i32
    %c0_i32_0 = arith.constant 0 : i32
    %c0_i32_1 = arith.constant 0 : i32
    return %c0_i32, %c0_i32_0 : i32, i32
  }
  func.func @transform_2(%arg0: i32) -> (i32, i32) {
    %c0_i32 = arith.constant 0 : i32
    %c0_i32_0 = arith.constant 0 : i32
    %c0_i32_1 = arith.constant 0 : i32
    return %c0_i32, %c0_i32_0 : i32, i32
  }
  func.func @transform_3(%arg0: i32) -> (i32, i32) {
    %c0_i32 = arith.constant 0 : i32
    %c0_i32_0 = arith.constant 0 : i32
    return %arg0, %c0_i32 : i32, i32
  }
}

</mosaic_0001>

<bundles_post_ra>
// kernel: tpu_custom_call.1
= control target key start
LH: loop header
LB: loop body
LE: loop exit
PB: predicated region body
PF: predicated region fallthrough
CT: control target
= control target key end

     0   :  { %8 = vsyncpa [#allocation3], 0  ;;  %s967_s0 = inlined_call_operand.hbm [shape: bf16[16,768], index: 0, kind: input, shape index: {}]   ;;  %s968_s1 = inlined_call_operand.hbm [shape: f32[1,768], index: 1, kind: input, shape index: {}]   ;;  %s969_s2 = inlined_call_operand.hbm [shape: f32[1,768], index: 2, kind: input, shape index: {}]   ;;  %s970_s3 = inlined_call_operand.hbm [shape: bf16[16,768], index: 3, kind: output, shape index: {}]  }
   0x1   :  { %10 = vsyncpa [#allocation3 + $0x1], 0 }
   0x2   :  { %11 = vsyncpa [#allocation6], 0 }
   0x3   :  { %12 = vsyncpa [#allocation4], 0 }
   0x4   :  { %14 = vsyncpa [#allocation4 + $0x1], 0  ;;  %s738_s12 = smov 0   ;;  %s740_s13 = smov 0  }
   0x5   :  { %s742_s14 = smov 0   ;;  %s744_s15 = smov 0  }
   0x6 LB: > { %s759_s16 = sadd.s32 4294967295, %s712_s15   ;;  %s465_s17 = sadd.s32 4294967294, %s712_s15   ;;  %s712_s15 = sphi %s744_s15, %s990_s15   ;;  %s708_s14 = sphi %s742_s14, %s989_s14   ;;  %s704_s13 = sphi %s740_s13, %s988_s13   ;;  %s700_s12 = sphi %s738_s12, %s987_s12  }
   0x7   : > { %p40_p0 = scmp.ne.s32.totalorder %s704_s13, %s700_s12  ;;  %p971_p1 = scmp.eq.s32.totalorder %s759_s16, 0 }
   0x8   : > { %p112_p3 = scmp.eq.s32.totalorder %s465_s17, 1  ;;  %p466_p5 = scmp.ge.s32.totalorder %s712_s15, 1 }
   0x9   : > { %p768_p4 = por %p971_p1, %p40_p0  ;;  %p119_p7 = scmp.lt.s32.totalorder %s712_s15, 3 }
   0xa   : > { %p773_p6 = por %p112_p3, %p40_p0  ;;  %s714_s21 = smov [#allocation5]  }
   0xb   : > { %s974_s18 = scalar_select %p768_p4, 1, 0 }
   0xc   : > { %s975_s19 = scalar_select %p773_p6, 1, 0 }
   0xd   : > { %p778_p8 = pnand %p466_p5, %p119_p7  ;;  %s132_s22 = sshll.u32 %s714_s21, 4  ;;  %s133_s22 = int_to_ptr.vmem [resolvable:$true] %s132_s22 }
   0xe   : > { %s715_s23 = smov [#allocation7]   ;;  %s794_s26 = sadd.s32 1, %s712_s15  }
   0xf   : > { %s976_s20 = scalar_select %p778_p8, 1, 0 }
  0x10   : > { %p499_p10 = pneg %p778_p8  ;;  %s143_s24 = sshll.u32 %s715_s23, 4  ;;  %s791_s24 = int_to_ptr.vmem [resolvable:$true] %s143_s24 }
  0x11   : > { %s24_s27 = ssub.s32 %s712_s15, %s794_s26  ;;  %s556_s30 = scalar_lea.hbm %s968_s1, 96 }
  0x12   : > { %p787_p11 = pnand %p499_p10, %p971_p1  ;;  %p557_p12 = scmp.ne.s32.totalorder %s968_s1, %s556_s30 }
  0x13   : > { %p563_p5 = scmp.lt.u32.totalorder %s556_s30, %s968_s1 }
  0x14   : > { %p558_p13 = pneg %p787_p11 }
  0x16   : > { %p559_p0 = pnand %p558_p13, %p557_p12 }
  0x18   : > { %p560_p3 = pneg %p559_p0 }
  0x1a   : > { %p565_p7 = pnand %p563_p5, %p560_p3 }
  0x1c   : > { %568 = shalt.err (!%p565_p7)
}
  0x1d   : > { %s569_s8 = scalar_lea.vmem %s133_s22, 96  ;;  %p577_p2 = scmp.lt.s32.totalorder %s133_s22, %s133_s22 }
  0x1e   : > { %p570_p10 = scmp.ne.s32.totalorder %s133_s22, %s569_s8  ;;  %p578_p6 = scmp.lt.s32.totalorder %s569_s8, %s569_s8 }
  0x20   : > { %p572_p9 = pnand %p570_p10, %p558_p13  ;;  %p579_p4 = por %p578_p6, %p577_p2 }
  0x22   : > { %p573_p1 = pneg %p572_p9 }
  0x24   : > { %p580_p8 = pnand %p579_p4, %p573_p1 }
  0x26   : > { %583 = shalt.err (!%p580_p8)
}
  0x27   : > { %502 = dma.hbm_to_vmem [thread:$0]  (!%p787_p11), %s968_s1, 96, %s133_s22, [#allocation6]  }
  0x28   : > { %s584_s21 = scalar_lea.hbm %s969_s2, 96 }
  0x29   : > { %p585_p9 = scmp.ne.s32.totalorder %s969_s2, %s584_s21  ;;  %p591_p4 = scmp.lt.u32.totalorder %s584_s21, %s969_s2 }
  0x2b   : > { %p587_p2 = pnand %p585_p9, %p558_p13 }
  0x2d   : > { %p588_p1 = pneg %p587_p2 }
  0x2f   : > { %p593_p6 = pnand %p591_p4, %p588_p1 }
  0x31   : > { %596 = shalt.err (!%p593_p6)
}
  0x32   : > { %s597_s22 = scalar_lea.vmem %s791_s24, 96  ;;  %p605_p3 = scmp.lt.s32.totalorder %s791_s24, %s791_s24 }
  0x33   : > { %p598_p8 = scmp.ne.s32.totalorder %s791_s24, %s597_s22  ;;  %p606_p5 = scmp.lt.s32.totalorder %s597_s22, %s597_s22 }
  0x35   : > { %p600_p12 = pnand %p598_p8, %p558_p13  ;;  %p607_p7 = por %p606_p5, %p605_p3 }
  0x37   : > { %p601_p0 = pneg %p600_p12 }
  0x39   : > { %p608_p10 = pnand %p607_p7, %p601_p0 }
  0x3b   : > { %611 = shalt.err (!%p608_p10)
}
  0x3c   : > { %505 = dma.hbm_to_vmem [thread:$0]  (!%p787_p11), %s969_s2, 96, %s791_s24, [#allocation6]  }
  0x3d   : > { %p25_p13 = scmp.eq.s32.totalorder %s24_s27, 0  ;;  %s27_s6 = sadd.s32 1, %s708_s14 }
  0x3e   : > { %p34_p9 = scmp.ne.s32.totalorder %s708_s14, %s704_s13  ;;  %p35_p2 = scmp.eq.s32.totalorder %s712_s15, 0 }
  0x3f   : > { %s853_s25 = scalar_select %p25_p13, %s708_s14, %s27_s6  }
  0x40   : > { %p36_p1 = por %p35_p2, %p34_p9  ;;  %p978_p4 = scmp.eq.s32.totalorder %s759_s16, 1 }
  0x41   : > { %p516_p8 = scmp.lt.s32.totalorder %s712_s15, 2  ;;  %s154_s8 = sand.u32 1, %s708_s14  }
  0x42   : > { %p857_p6 = por %p978_p4, %p34_p9  ;;  %s483_s9 = smul.u32 24, %s154_s8 }
  0x43   : > { %s484_s10 = smul.u32 384, %s712_s15  ;;  %p864_p12 = pnand %p516_p8, %p36_p1 }
  0x44   : > { %s158_s21 = scalar_lea.vmem [#allocation2], %s483_s9  ;;  %s155_s28 = scalar_lea.sflag [#allocation3], %s154_s8 }
  0x45   : > { %s871_s17 = scalar_lea.hbm %s967_s0, %s484_s10  ;;  %s166_s23 = sshll.u32 %s158_s21, 4  ;;  %s873_s23 = int_to_ptr.vmem [resolvable:$true] %s166_s23 }
  0x46   : > { %s612_s29 = scalar_lea.hbm %s871_s17, 384  ;;  %p614_p0 = pneg %p864_p12 }
  0x47   : > { %p613_p11 = scmp.ne.s32.totalorder %s871_s17, %s612_s29  ;;  %s617_s4 = scalar_lea.hbm %s967_s0, 768 }
  0x48   : > { %p618_p7 = scmp.lt.u32.totalorder %s871_s17, %s967_s0  ;;  %p619_p10 = scmp.lt.u32.totalorder %s617_s4, %s612_s29 }
  0x49   : > { %p615_p3 = pnand %p614_p0, %p613_p11  ;;  %p621_p9 = scmp.lt.u32.totalorder %s612_s29, %s871_s17 }
  0x4a   : > { %p620_p13 = por %p619_p10, %p618_p7 }
  0x4b   : > { %p616_p5 = pneg %p615_p3 }
  0x4c   : > { %p622_p2 = por %p621_p9, %p620_p13 }
  0x4e   : > { %p623_p1 = pnand %p622_p2, %p616_p5 }
  0x50   : > { %626 = shalt.err (!%p623_p1)
}
  0x51   : > { %s627_s8 = scalar_lea.vmem %s873_s23, 384  ;;  %s716_s9 = smov [#allocation2]  }
  0x52   : > { %p628_p4 = scmp.ne.s32.totalorder %s873_s23, %s627_s8  ;;  %s632_s10 = sshll.u32 %s716_s9, 4  ;;  %s633_s10 = int_to_ptr.vmem [resolvable:$false] %s632_s10 }
  0x53   : > { %s634_s24 = scalar_lea.vmem %s633_s10, 768  ;;  %p635_p3 = scmp.lt.s32.totalorder %s873_s23, %s633_s10 }
  0x54   : > { %p630_p8 = pnand %p628_p4, %p614_p0  ;;  %p636_p7 = scmp.lt.s32.totalorder %s634_s24, %s627_s8 }
  0x56   : > { %p631_p11 = pneg %p630_p8  ;;  %p637_p10 = por %p636_p7, %p635_p3 }
  0x58   : > { %p638_p13 = pnand %p637_p10, %p631_p11 }
  0x5a   : > { %641 = shalt.err (!%p638_p13)
}
  0x5b   : > { %509 = dma.hbm_to_vmem [thread:$0]  (!%p864_p12), %s871_s17, 384, %s873_s23, %s155_s28  }
  0x5c   : > { %p981_p5 = scmp.ne.s32.totalorder %s976_s20, 0 }
  0x5d   : > { %s903_s27 = sand.u32 (!%p981_p5), 1, %s704_s13   ;;  %p982_p0 = scmp.ne.s32.totalorder (!%p981_p5), %s974_s18, 0 }
  0x5e   : > { %175 = sbr.rel (%p981_p5) target bundleno = 456 (0x1c8), region = 32  ;;  %s178_s29 = scalar_lea.sflag (!%p981_p5), [#allocation3], %s903_s27 }
  0x5f   : > { %s485_s21 = smul.u32 (!%p981_p5), 24, %s903_s27 }
  0x61   : > { %s181_s30 = scalar_lea.vmem (!%p981_p5), [#allocation2], %s485_s21 }
  0x65   : > { %687 = dma.done.wait (%p982_p0), %s178_s29, 384  }
  0x66   : > { %689 = vsyncadd (%p982_p0), %s178_s29, 4294966912  ;;  %p983_p12 = scmp.eq.s32.totalorder %s759_s16, 0 }
  0x68   : > { %691 = dma.done.wait (%p983_p12), [#allocation6], 192   ;;  %p984_p9 = pmov %p983_p12 }
  0x69   : > { %v212_v0 = vld [vmem:[%s181_s30] sm:$0xff]  ;;  %v213_v1 = vld [vmem:[%s181_s30 + $0x8] sm:$0xff]  ;;  %v214_v5 = vld [vmem:[%s181_s30 + $0x10] sm:$0xff]  ;;  %v261_v35 = vlaneseq  ;;  %s486_s18 = smul.u32 384, %s759_s16  ;;  %s211_s20 = scalar_lea.vmem [#allocation8], %s485_s21 }
  0x6a   : > { %693 = vsyncadd (%p984_p9), [#allocation6], 4294967104  ;;  %v215_v2 = vunpack.c.l.bf16 %v212_v0  ;;  %v216_v3 = vunpack.c.h.bf16 %v212_v0  ;;  %v217_v4 = vunpack.c.l.bf16 %v213_v1  ;;  %v218_v6 = vunpack.c.h.bf16 %v213_v1  ;;  %v221_v40 = vld [vmem:[#allocation5] sm:$0x3f]  ;;  %v222_v45 = vld [vmem:[#allocation7] sm:$0x3f] }
  0x6b   : > { %v219_v8 = vunpack.c.l.bf16 %v214_v5  ;;  %v220_v10 = vunpack.c.h.bf16 %v214_v5  ;;  %v262_v37 = vshrl.u32 %v261_v35, 7  ;;  %s376_s11 = sshll.u32 %s211_s20, 4  ;;  %s923_s28 = scalar_lea.hbm %s970_s3, %s486_s18  ;;  %s925_s11 = int_to_ptr.vmem [resolvable:$true] %s376_s11 }
  0x6c   : > { %v223_v7 = vadd.f32 %v216_v3, %v215_v2  ;;  %s362_s16 = scalar_lea.sflag [#allocation4], %s903_s27  ;;  %s642_s22 = scalar_lea.vmem %s925_s11, 384 }
  0x6d   : > { %v263_v38 = vsub.s32 0, %v262_v37  ;;  %v267_v39 = vsub.s32 1, %v262_v37  ;;  %v271_v41 = vsub.s32 2, %v262_v37  ;;  %v275_v42 = vsub.s32 3, %v262_v37  ;;  %p643_p2 = scmp.ne.s32.totalorder %s925_s11, %s642_s22  ;;  %s717_s4 = smov [#allocation8]  }
  0x6e   : > { %v224_v9 = vadd.f32 %v223_v7, %v217_v4  ;;  %v279_v43 = vsub.s32 4, %v262_v37  ;;  %v283_v44 = vsub.s32 5, %v262_v37  ;;  %s646_s5 = sshll.u32 %s717_s4, 4  ;;  %s647_s5 = int_to_ptr.vmem [resolvable:$false] %s646_s5 }
  0x6f   : > { %v264_v46 = vrot.slane %v221_v40, %v263_v38  ;;  %v268_v47 = vrot.slane %v221_v40, %v267_v39  ;;  %v272_v48 = vrot.slane %v221_v40, %v271_v41  ;;  %v276_v49 = vrot.slane %v221_v40, %v275_v42  ;;  %p644_p1 = pnand %p643_p2, %p857_p6  ;;  %s648_s6 = scalar_lea.vmem %s647_s5, 768 }
  0x70   : > { %v225_v11 = vadd.f32 %v224_v9, %v218_v6  ;;  %v280_v50 = vrot.slane %v221_v40, %v279_v43  ;;  %v284_v51 = vrot.slane %v221_v40, %v283_v44  ;;  %v301_v53 = vrot.slane %v222_v45, %v263_v38  ;;  %p649_p8 = scmp.lt.s32.totalorder %s925_s11, %s647_s5  ;;  %p650_p11 = scmp.lt.s32.totalorder %s648_s6, %s642_s22 }
  0x71   : > { %v305_v54 = vrot.slane %v222_v45, %v267_v39  ;;  %v309_v55 = vrot.slane %v222_v45, %v271_v41  ;;  %v313_v56 = vrot.slane %v222_v45, %v275_v42  ;;  %v317_v63 = vrot.slane %v222_v45, %v279_v43  ;;  %p645_p4 = pneg %p644_p1 }
  0x72   : > { %v226_v12 = vadd.f32 %v225_v11, %v219_v8  ;;  %v321_v0 = vrot.slane %v222_v45, %v283_v44  ;;  %p651_p3 = por %p650_p11, %p649_p8 }
  0x74   : > { %v227_v13 = vadd.f32 %v226_v12, %v220_v10  ;;  %p652_p7 = pnand %p651_p3, %p645_p4 }
  0x76   : > { %228 = vadd.xlane.f32.xlu0 %v227_v13 }
 0x103   : > { %v229_v14 = vpop.xlane.xlu0 %228 }
 0x104   : > { %v231_v15 = vmul.f32 0.0013020834, %v229_v14 }
 0x106   : > { %v232_v16 = vsub.f32 %v215_v2, %v231_v15  ;;  %v233_v17 = vsub.f32 %v216_v3, %v231_v15  ;;  %v234_v18 = vsub.f32 %v217_v4, %v231_v15  ;;  %v235_v19 = vsub.f32 %v218_v6, %v231_v15 }
 0x107   : > { %v236_v22 = vsub.f32 %v219_v8, %v231_v15  ;;  %v237_v25 = vsub.f32 %v220_v10, %v231_v15 }
 0x108   : > { %v238_v20 = vmul.f32 %v232_v16, %v232_v16  ;;  %v239_v21 = vmul.f32 %v233_v17, %v233_v17  ;;  %v240_v23 = vmul.f32 %v234_v18, %v234_v18  ;;  %v241_v26 = vmul.f32 %v235_v19, %v235_v19 }
 0x109   : > { %v242_v28 = vmul.f32 %v236_v22, %v236_v22  ;;  %v243_v30 = vmul.f32 %v237_v25, %v237_v25 }
 0x10a   : > { %v244_v24 = vadd.f32 %v239_v21, %v238_v20 }
 0x10c   : > { %v245_v27 = vadd.f32 %v244_v24, %v240_v23 }
 0x10e   : > { %v246_v29 = vadd.f32 %v245_v27, %v241_v26 }
 0x110   : > { %v247_v31 = vadd.f32 %v246_v29, %v242_v28 }
 0x112   : > { %v248_v32 = vadd.f32 %v247_v31, %v243_v30 }
 0x114   : > { %249 = vadd.xlane.f32.xlu0 %v248_v32 }
 0x1a1   : > { %v250_v33 = vpop.xlane.xlu0 %249 }
 0x1a2   : > { %v251_v34 = vmul.f32 0.0013020834, %v250_v33 }
 0x1a4   : > { %v252_v36 = vadd.f32 1e-12, %v251_v34 }
 0x1a6   : > { %554 = vrsqrt.f32 %v252_v36 }
 0x1b0   : > { %v555_v52 = vpop.eup %554 }
 0x1b1   : > { %v254_v57 = vmul.f32 %v555_v52, %v232_v16  ;;  %v255_v58 = vmul.f32 %v555_v52, %v233_v17  ;;  %v256_v59 = vmul.f32 %v555_v52, %v234_v18  ;;  %v257_v60 = vmul.f32 %v555_v52, %v235_v19 }
 0x1b2   : > { %v258_v61 = vmul.f32 %v555_v52, %v236_v22  ;;  %v259_v62 = vmul.f32 %v555_v52, %v237_v25 }
 0x1b3   : > { %v291_v1 = vmul.f32 %v264_v46, %v254_v57  ;;  %v292_v2 = vmul.f32 %v268_v47, %v255_v58  ;;  %v293_v3 = vmul.f32 %v272_v48, %v256_v59  ;;  %v294_v4 = vmul.f32 %v276_v49, %v257_v60 }
 0x1b4   : > { %v295_v5 = vmul.f32 %v280_v50, %v258_v61  ;;  %v296_v6 = vmul.f32 %v284_v51, %v259_v62 }
 0x1b5   : > { %v328_v7 = vadd.f32 %v301_v53, %v291_v1  ;;  %v329_v8 = vadd.f32 %v305_v54, %v292_v2  ;;  %v330_v9 = vadd.f32 %v309_v55, %v293_v3  ;;  %v331_v10 = vadd.f32 %v313_v56, %v294_v4 }
 0x1b6   : > { %v332_v11 = vadd.f32 %v317_v63, %v295_v5  ;;  %v333_v12 = vadd.f32 %v321_v0, %v296_v6 }
 0x1b7   : > { %v480_v13 = vpack.c.bf16 %v329_v8, %v328_v7  ;;  %v481_v14 = vpack.c.bf16 %v331_v10, %v330_v9 }
 0x1b8   : > { %v482_v15 = vpack.c.bf16 %v333_v12, %v332_v11 }
 0x1b9   : > { %358 = vst [vmem:[%s211_s20] sm:$0xff] %v480_v13  ;;  %359 = vst [vmem:[%s211_s20 + $0x8] sm:$0xff] %v481_v14 }
 0x1ba   : > { %360 = vst [vmem:[%s211_s20 + $0x10] sm:$0xff] %v482_v15 }
 0x1bb   : > { %655 = shalt.err (!%p652_p7)
}
 0x1bc   : > { %s656_s8 = scalar_lea.hbm %s923_s28, 384  ;;  %s660_s24 = scalar_lea.hbm %s970_s3, 768 }
 0x1bd   : > { %p657_p10 = scmp.ne.s32.totalorder %s923_s28, %s656_s8  ;;  %p661_p0 = scmp.lt.u32.totalorder %s923_s28, %s970_s3 }
 0x1be   : > { %p662_p12 = scmp.lt.u32.totalorder %s660_s24, %s656_s8  ;;  %p664_p2 = scmp.lt.u32.totalorder %s656_s8, %s923_s28 }
 0x1bf   : > { %p658_p13 = pnand %p657_p10, %p857_p6 }
 0x1c0   : > { %p663_p9 = por %p662_p12, %p661_p0 }
 0x1c1   : > { %p659_p5 = pneg %p658_p13 }
 0x1c2   : > { %p665_p1 = por %p664_p2, %p663_p9 }
 0x1c4   : > { %p666_p4 = pnand %p665_p1, %p659_p5 }
 0x1c6   : > { %669 = shalt.err (!%p666_p4)
}
 0x1c7   : > { %497 = dma.vmem_to_hbm [thread:$0]  (%p857_p6), %s925_s11, 384, %s923_s28, %s362_s16  }
 0x1c8 PF: > { %s388_s29 = sand.u32 1, %s700_s12   ;;  %p985_p8 = scmp.ne.s32.totalorder %s975_s19, 0 }
 0x1c9   : > { %p986_p11 = scmp.ge.s32.totalorder %s712_s15, 2  ;;  %s389_s30 = scalar_lea.sflag [#allocation4], %s388_s29 }
 0x1cb   : > { %p511_p3 = pnand %p986_p11, %p985_p8 }
 0x1cd   : > { %695 = dma.done.wait (!%p511_p3), %s389_s30, 384  }
 0x1ce   : > { %697 = vsyncadd (!%p511_p3), %s389_s30, 4294966912  ;;  %p17_p7 = scmp.ge.s32.totalorder %s794_s26, 4   ;;  %s987_s12 = smov %s704_s13 }
 0x1cf   : > { %s988_s13 = smov %s708_s14  ;;  %s989_s14 = smov %s853_s25 }
 0x1d0   : > { %s990_s15 = smov %s794_s26  ;;  %19 = sbr.rel (!%p17_p7) target bundleno = 6 (0x6), region = 85 }
 0x1d7   :  { %394 = vsyncpa [#allocation3], 1 }
 0x1d8   :  { %396 = vsyncpa [#allocation3 + $0x1], 1 }
 0x1d9   :  { %397 = vsyncpa [#allocation6], 1 }
 0x1da   :  { %398 = vsyncpa [#allocation4], 1 }
 0x1db   :  { %400 = vsyncpa [#allocation4 + $0x1], 1 }

</bundles_post_ra>
